<compile_context>
chip_gen: v7x
topology: tpu7x:2x2x1
jax: 0.10.0
libtpu: 0.0.40
codegen_flags: <defaults>
</compile_context>

<pallas_src>
import functools

import jax
import jax.numpy as jnp
from jax.experimental import pallas as pl
from jax.experimental.pallas import tpu as pltpu

EPS = 1e-5
COMPUTE_DTYPE = jnp.bfloat16  # MXU-native; accumulation stays f32.


def _conv_stats_kernel(x_ref, w_ref, mask_ref, conv_ref, stats_ref, rhs_ref, *,
                       K, Wp):
    """Pass 1: single-matmul conv + per-image per-channel sum / sum-of-squares.

    x_ref:    (1, Cin, Lp)  bf16 — one padded image, spatial flattened (row
              stride Wp), zero tail so every shifted read stays in-bounds.
    w_ref:    (Cout, K*K*Cin) bf16 — weights, row order (kh*K+kw)*Cin + ci.
    mask_ref: (1, T) f32 — 1.0 on real output columns (t % Wp < Wo) else 0.0.
    conv_ref: (1, Cout, T) f32 — conv output on the padded-width grid
              (garbage columns are masked here and cropped in pass 2).
    stats_ref:(1, Cout, 2) f32 — per-image (sum, sumsq) over real columns.
    rhs_ref:  (K*K*Cin, T) f32 VMEM scratch — im2col operand (built in VMEM
              only; never touches HBM).
    """
    cin = x_ref.shape[1]
    lp = x_ref.shape[2]
    T = rhs_ref.shape[1]

    x = x_ref[0].astype(jnp.float32)                    # (Cin, Lp)
    for kh in range(K):
        for kw in range(K):
            d = kh * Wp + kw                            # flattened tap offset
            # Logical left-shift by d via a circular right-roll (XLU); real
            # output columns never wrap because Lp >= Hp*Wp.
            shifted = x if d == 0 else pltpu.roll(x, lp - d, axis=1)
            rhs_ref[pl.ds((kh * K + kw) * cin, cin), :] = shifted[:, :T]

    rhs = rhs_ref[...].astype(COMPUTE_DTYPE)            # (K*K*Cin, T) bf16
    conv = jnp.dot(w_ref[...], rhs,
                   preferred_element_type=jnp.float32)  # (Cout, T) f32, 1 matmul
    conv_ref[0] = conv                                   # lane-dense store

    masked = conv * mask_ref[...]                        # zero padded-width cols
    stats_ref[0, :, 0:1] = jnp.sum(masked, axis=1, keepdims=True)
    stats_ref[0, :, 1:2] = jnp.sum(masked * conv, axis=1, keepdims=True)


def _bn_relu_kernel(conv_ref, ss_ref, o_ref, *, Wo):
    """Pass 2: elementwise normalize/affine/ReLU + padded-width crop.

    conv_ref: (1, Cout, Ho, Wp) f32 — same HBM buffer as pass-1's output, viewed
              4-D via a free wrapper reshape.
    ss_ref:   (2, Cout, 1, 1) f32 — stacked per-channel (scale, shift).
    o_ref:    (1, Cout, Ho, Wo) f32 — final NCHW output block.
    """
    conv = conv_ref[0]                                   # (Cout, Ho, Wp)
    y = conv[:, :, :Wo] * ss_ref[0] + ss_ref[1]          # offset-0 lane crop
    o_ref[0] = jnp.maximum(y, 0.0)


@functools.partial(jax.jit, static_argnames=("padding",))
def conv_block_pallas(x_nchw, w_oihw, bias, gamma, beta, *, padding):
    """Conv2d(pad=padding) + BatchNorm2d(training) + ReLU.  x is NCHW f32."""
    del bias  # Per-channel conv bias is cancelled exactly by training-mode BN.
    N, Cin, H, W = x_nchw.shape
    Cout, _, K, _ = w_oihw.shape
    P = padding
    Hp, Wp = H + 2 * P, W + 2 * P
    Ho, Wo = Hp - K + 1, Wp - K + 1
    L = Hp * Wp
    T = Ho * Wp                          # conv output on the padded-width grid
    Lp = ((L + 127) // 128) * 128        # lane-pad so in-kernel rolls are clean

    # ---- glue: bf16 cast BEFORE pad (single small HBM pass over x), flatten
    # spatial with row stride Wp, zero tail to Lp.  No K*K duplication.
    xpad = jnp.pad(x_nchw.astype(COMPUTE_DTYPE), ((0, 0), (0, 0), (P, P), (P, P)))
    xflat = jnp.pad(xpad.reshape(N, Cin, L), ((0, 0), (0, 0), (0, Lp - L)))
    # Weights flattened to match the RHS row order (kh*K+kw)*Cin + ci.
    wk = jnp.transpose(w_oihw, (0, 2, 3, 1)).reshape(Cout, K * K * Cin)
    wk = wk.astype(COMPUTE_DTYPE)
    # Real (non-wraparound) columns of the padded-width output grid.
    mask = ((jnp.arange(T, dtype=jnp.int32) % Wp) < Wo)
    mask = mask.astype(jnp.float32).reshape(1, T)

    cparams = pltpu.CompilerParams(dimension_semantics=("parallel",),
                                   vmem_limit_bytes=32 * 1024 * 1024)

    # -------- pass 1: conv (single matmul) + per-image per-channel stats
    conv_flat, stats = pl.pallas_call(
        functools.partial(_conv_stats_kernel, K=K, Wp=Wp),
        out_shape=(jax.ShapeDtypeStruct((N, Cout, T), jnp.float32),
                   jax.ShapeDtypeStruct((N, Cout, 2), jnp.float32)),
        grid=(N,),
        in_specs=[
            pl.BlockSpec((1, Cin, Lp), lambda n: (n, 0, 0)),
            pl.BlockSpec((Cout, K * K * Cin), lambda n: (0, 0)),
            pl.BlockSpec((1, T), lambda n: (0, 0)),
        ],
        out_specs=(
            pl.BlockSpec((1, Cout, T), lambda n: (n, 0, 0)),
            pl.BlockSpec((1, Cout, 2), lambda n: (n, 0, 0)),
        ),
        scratch_shapes=[pltpu.VMEM((K * K * Cin, T), jnp.float32)],
        compiler_params=cparams,
    )(xflat, wk, mask)

    # Tiny per-channel BN folding (Cout scalars) — plain JAX glue between passes.
    cnt = jnp.float32(N * Ho * Wo)
    ssum = stats[:, :, 0].sum(axis=0)
    ssq = stats[:, :, 1].sum(axis=0)
    mean = ssum / cnt
    var = jnp.maximum(ssq / cnt - mean * mean, 0.0)   # biased var (training BN)
    scale = gamma.astype(jnp.float32) * jax.lax.rsqrt(var + EPS)
    shift = beta.astype(jnp.float32) - mean * scale
    ss = jnp.stack([scale, shift]).reshape(2, Cout, 1, 1).astype(jnp.float32)

    # Free metadata reshape: same HBM bytes, viewed as (N, Cout, Ho, Wp).
    conv4d = conv_flat.reshape(N, Cout, Ho, Wp)

    # -------- pass 2: fused normalize/affine/ReLU + crop -> NCHW output directly
    out = pl.pallas_call(
        functools.partial(_bn_relu_kernel, Wo=Wo),
        out_shape=jax.ShapeDtypeStruct((N, Cout, Ho, Wo), jnp.float32),
        grid=(N,),
        in_specs=[
            pl.BlockSpec((1, Cout, Ho, Wp), lambda n: (n, 0, 0, 0)),
            pl.BlockSpec((2, Cout, 1, 1), lambda n: (0, 0, 0, 0)),
        ],
        out_specs=pl.BlockSpec((1, Cout, Ho, Wo), lambda n: (n, 0, 0, 0)),
        compiler_params=cparams,
    )(conv4d, ss)
    return out


def conv_block_reference(x_nchw, w_oihw, bias, gamma, beta, padding):
    """Pure-JAX reference mirroring the PyTorch forward (training-mode BN + ReLU)."""
    conv = jax.lax.conv_general_dilated(
        x_nchw.astype(jnp.float32), w_oihw.astype(jnp.float32),
        window_strides=(1, 1), padding=[(padding, padding), (padding, padding)],
        dimension_numbers=("NCHW", "OIHW", "NCHW"))
    conv = conv + bias[None, :, None, None]
    mean = conv.mean(axis=(0, 2, 3), keepdims=True)
    var = ((conv - mean) ** 2).mean(axis=(0, 2, 3), keepdims=True)
    xhat = (conv - mean) * jax.lax.rsqrt(var + EPS)
    y = xhat * gamma[None, :, None, None] + beta[None, :, None, None]
    return jnp.maximum(y, 0.0)


if __name__ == "__main__":
    # Shapes consistent with the module: in_channels=4, out_channels=8,
    # kernel_size=3, padding=1, act=ReLU.
    N, Cin, H, W = 2, 4, 16, 16
    Cout, K, P = 8, 3, 1

    key = jax.random.PRNGKey(0)
    k_x, k_w, k_b = jax.random.split(key, 3)
    x = jax.random.normal(k_x, (N, Cin, H, W), dtype=jnp.float32)
    w = 0.1 * jax.random.normal(k_w, (Cout, Cin, K, K), dtype=jnp.float32)
    b = 0.1 * jax.random.normal(k_b, (Cout,), dtype=jnp.float32)
    gamma = jnp.ones((Cout,), dtype=jnp.float32)    # BatchNorm2d default init
    beta = jnp.zeros((Cout,), dtype=jnp.float32)

    out = conv_block_pallas(x, w, b, gamma, beta, padding=P)
    out = jax.block_until_ready(out)

    # Reference on the same bf16-rounded conv inputs (the kernel's MXU compute
    # dtype), full f32 math.  The reference keeps the conv bias: it must cancel
    # under training-mode BN, which also validates dropping it in the kernel.
    x_r = x.astype(COMPUTE_DTYPE).astype(jnp.float32)
    w_r = w.astype(COMPUTE_DTYPE).astype(jnp.float32)
    ref = conv_block_reference(x_r, w_r, b, gamma, beta, P)

    assert out.shape == (N, Cout, H, W)
    max_err = float(jnp.max(jnp.abs(out - ref)))
    assert jnp.allclose(out, ref, atol=1e-4, rtol=1e-4), max_err

    print("KERNEL_OK")
</pallas_src>

<mosaic_0001>
module attributes {stable_mosaic.version = 11 : i64} {
  func.func @_conv_stats_kernel(%arg0: i32, %arg1: memref<1x4x384xbf16, #tpu.memory_space<vmem>>, %arg2: memref<8x36xbf16, #tpu.memory_space<vmem>>, %arg3: memref<1x288xf32, #tpu.memory_space<vmem>>, %arg4: memref<1x8x288xf32, #tpu.memory_space<vmem>>, %arg5: memref<1x8x2xf32, #tpu.memory_space<vmem>>, %arg6: memref<36x288xf32, #tpu.memory_space<vmem>>) attributes {dimension_semantics = [#tpu.dimension_semantics<parallel>], iteration_bounds = array<i64: 2>, scalar_prefetch = 0 : i64, scratch_operands = 1 : i64, tpu.core_type = #tpu.core_type<tc>, window_params = [{transform_indices = @transform_0, window_bounds = array<i64: 1, 4, 384>}, {pipeline_mode = #tpu.pipeline_mode<synchronous>, transform_indices = @transform_1, window_bounds = array<i64: 8, 36>}, {pipeline_mode = #tpu.pipeline_mode<synchronous>, transform_indices = @transform_2, window_bounds = array<i64: 1, 288>}, {transform_indices = @transform_3, window_bounds = array<i64: 1, 8, 288>}, {transform_indices = @transform_4, window_bounds = array<i64: 1, 8, 2>}]} {
    %c0 = arith.constant 0 : index
    %c0_0 = arith.constant 0 : index
    %c0_1 = arith.constant 0 : index
    %0 = vector.load %arg1[%c0, %c0_0, %c0_1] : memref<1x4x384xbf16, #tpu.memory_space<vmem>>, vector<1x4x384xbf16>
    %1 = vector.shape_cast %0 : vector<1x4x384xbf16> to vector<4x384xbf16>
    %2 = arith.extf %1 : vector<4x384xbf16> to vector<4x384xf32>
    %3 = vector.extract_strided_slice %2 {offsets = [0, 0], sizes = [4, 288], strides = [1, 1]} : vector<4x384xf32> to vector<4x288xf32>
    %c0_2 = arith.constant 0 : index
    %c0_3 = arith.constant 0 : index
    %4 = vector.load %arg6[%c0_2, %c0_3] : memref<36x288xf32, #tpu.memory_space<vmem>>, vector<4x288xf32>
    tpu.vector_store %arg6[%c0_2, %c0_3], %3 {strides = array<i32>} : memref<36x288xf32, #tpu.memory_space<vmem>>, vector<4x288xf32>,
    %c383_i32 = arith.constant 383 : i32
    %5 = tpu.dynamic_rotate %2 by %c383_i32 dim 1 : vector<4x384xf32>, i32 -> vector<4x384xf32>
    %6 = vector.extract_strided_slice %5 {offsets = [0, 0], sizes = [4, 288], strides = [1, 1]} : vector<4x384xf32> to vector<4x288xf32>
    %c4 = arith.constant 4 : index
    %c0_4 = arith.constant 0 : index
    %7 = vector.load %arg6[%c4, %c0_4] : memref<36x288xf32, #tpu.memory_space<vmem>>, vector<4x288xf32>
    tpu.vector_store %arg6[%c4, %c0_4], %6 {strides = array<i32>} : memref<36x288xf32, #tpu.memory_space<vmem>>, vector<4x288xf32>,
    %c382_i32 = arith.constant 382 : i32
    %8 = tpu.dynamic_rotate %2 by %c382_i32 dim 1 : vector<4x384xf32>, i32 -> vector<4x384xf32>
    %9 = vector.extract_strided_slice %8 {offsets = [0, 0], sizes = [4, 288], strides = [1, 1]} : vector<4x384xf32> to vector<4x288xf32>
    %c8 = arith.constant 8 : index
    %c0_5 = arith.constant 0 : index
    %10 = vector.load %arg6[%c8, %c0_5] : memref<36x288xf32, #tpu.memory_space<vmem>>, vector<4x288xf32>
    tpu.vector_store %arg6[%c8, %c0_5], %9 {strides = array<i32>} : memref<36x288xf32, #tpu.memory_space<vmem>>, vector<4x288xf32>,
    %c366_i32 = arith.constant 366 : i32
    %11 = tpu.dynamic_rotate %2 by %c366_i32 dim 1 : vector<4x384xf32>, i32 -> vector<4x384xf32>
    %12 = vector.extract_strided_slice %11 {offsets = [0, 0], sizes = [4, 288], strides = [1, 1]} : vector<4x384xf32> to vector<4x288xf32>
    %c12 = arith.constant 12 : index
    %c0_6 = arith.constant 0 : index
    %13 = vector.load %arg6[%c12, %c0_6] : memref<36x288xf32, #tpu.memory_space<vmem>>, vector<4x288xf32>
    tpu.vector_store %arg6[%c12, %c0_6], %12 {strides = array<i32>} : memref<36x288xf32, #tpu.memory_space<vmem>>, vector<4x288xf32>,
    %c365_i32 = arith.constant 365 : i32
    %14 = tpu.dynamic_rotate %2 by %c365_i32 dim 1 : vector<4x384xf32>, i32 -> vector<4x384xf32>
    %15 = vector.extract_strided_slice %14 {offsets = [0, 0], sizes = [4, 288], strides = [1, 1]} : vector<4x384xf32> to vector<4x288xf32>
    %c16 = arith.constant 16 : index
    %c0_7 = arith.constant 0 : index
    %16 = vector.load %arg6[%c16, %c0_7] : memref<36x288xf32, #tpu.memory_space<vmem>>, vector<4x288xf32>
    tpu.vector_store %arg6[%c16, %c0_7], %15 {strides = array<i32>} : memref<36x288xf32, #tpu.memory_space<vmem>>, vector<4x288xf32>,
    %c364_i32 = arith.constant 364 : i32
    %17 = tpu.dynamic_rotate %2 by %c364_i32 dim 1 : vector<4x384xf32>, i32 -> vector<4x384xf32>
    %18 = vector.extract_strided_slice %17 {offsets = [0, 0], sizes = [4, 288], strides = [1, 1]} : vector<4x384xf32> to vector<4x288xf32>
    %c20 = arith.constant 20 : index
    %c0_8 = arith.constant 0 : index
    %19 = vector.load %arg6[%c20, %c0_8] : memref<36x288xf32, #tpu.memory_space<vmem>>, vector<4x288xf32>
    tpu.vector_store %arg6[%c20, %c0_8], %18 {strides = array<i32>} : memref<36x288xf32, #tpu.memory_space<vmem>>, vector<4x288xf32>,
    %c348_i32 = arith.constant 348 : i32
    %20 = tpu.dynamic_rotate %2 by %c348_i32 dim 1 : vector<4x384xf32>, i32 -> vector<4x384xf32>
    %21 = vector.extract_strided_slice %20 {offsets = [0, 0], sizes = [4, 288], strides = [1, 1]} : vector<4x384xf32> to vector<4x288xf32>
    %c24 = arith.constant 24 : index
    %c0_9 = arith.constant 0 : index
    %22 = vector.load %arg6[%c24, %c0_9] : memref<36x288xf32, #tpu.memory_space<vmem>>, vector<4x288xf32>
    tpu.vector_store %arg6[%c24, %c0_9], %21 {strides = array<i32>} : memref<36x288xf32, #tpu.memory_space<vmem>>, vector<4x288xf32>,
    %c347_i32 = arith.constant 347 : i32
    %23 = tpu.dynamic_rotate %2 by %c347_i32 dim 1 : vector<4x384xf32>, i32 -> vector<4x384xf32>
    %24 = vector.extract_strided_slice %23 {offsets = [0, 0], sizes = [4, 288], strides = [1, 1]} : vector<4x384xf32> to vector<4x288xf32>
    %c28 = arith.constant 28 : index
    %c0_10 = arith.constant 0 : index
    %25 = vector.load %arg6[%c28, %c0_10] : memref<36x288xf32, #tpu.memory_space<vmem>>, vector<4x288xf32>
    tpu.vector_store %arg6[%c28, %c0_10], %24 {strides = array<i32>} : memref<36x288xf32, #tpu.memory_space<vmem>>, vector<4x288xf32>,
    %c346_i32 = arith.constant 346 : i32
    %26 = tpu.dynamic_rotate %2 by %c346_i32 dim 1 : vector<4x384xf32>, i32 -> vector<4x384xf32>
    %27 = vector.extract_strided_slice %26 {offsets = [0, 0], sizes = [4, 288], strides = [1, 1]} : vector<4x384xf32> to vector<4x288xf32>
    %c32 = arith.constant 32 : index
    %c0_11 = arith.constant 0 : index
    %28 = vector.load %arg6[%c32, %c0_11] : memref<36x288xf32, #tpu.memory_space<vmem>>, vector<4x288xf32>
    tpu.vector_store %arg6[%c32, %c0_11], %27 {strides = array<i32>} : memref<36x288xf32, #tpu.memory_space<vmem>>, vector<4x288xf32>,
    %c0_12 = arith.constant 0 : index
    %c0_13 = arith.constant 0 : index
    %29 = vector.load %arg6[%c0_12, %c0_13] : memref<36x288xf32, #tpu.memory_space<vmem>>, vector<36x288xf32>
    %30 = arith.truncf %29 : vector<36x288xf32> to vector<36x288xbf16>
    %c0_14 = arith.constant 0 : index
    %c0_15 = arith.constant 0 : index
    %31 = vector.load %arg2[%c0_14, %c0_15] : memref<8x36xbf16, #tpu.memory_space<vmem>>, vector<8x36xbf16>
    %cst = arith.constant dense<0.000000e+00> : vector<8x288xf32>
    %32 = tpu.matmul %31, %30, %cst {dimension_numbers = #tpu.dot_dimension_numbers<[1], [0], [0], [1], [0, 0, 1, 1], [], []>} : vector<8x36xbf16>, vector<36x288xbf16>, vector<8x288xf32> -> vector<8x288xf32>
    %c0_16 = arith.constant 0 : index
    %c0_17 = arith.constant 0 : index
    %c0_18 = arith.constant 0 : index
    %33 = vector.load %arg4[%c0_16, %c0_17, %c0_18] : memref<1x8x288xf32, #tpu.memory_space<vmem>>, vector<1x8x288xf32>
    %34 = vector.shape_cast %33 : vector<1x8x288xf32> to vector<8x288xf32>
    %35 = vector.shape_cast %32 : vector<8x288xf32> to vector<1x8x288xf32>
    tpu.vector_store %arg4[%c0_16, %c0_17, %c0_18], %35 {strides = array<i32>} : memref<1x8x288xf32, #tpu.memory_space<vmem>>, vector<1x8x288xf32>,
    %c0_19 = arith.constant 0 : index
    %c0_20 = arith.constant 0 : index
    %36 = vector.load %arg3[%c0_19, %c0_20] : memref<1x288xf32, #tpu.memory_space<vmem>>, vector<1x288xf32>
    %37 = vector.broadcast %36 : vector<1x288xf32> to vector<8x288xf32>
    %38 = arith.mulf %32, %37 : vector<8x288xf32>
    %cst_21 = arith.constant dense<0.000000e+00> : vector<8xf32>
    %39 = vector.multi_reduction <add>, %38, %cst_21 [1] : vector<8x288xf32> to vector<8xf32>
    %40 = vector.shape_cast %39 : vector<8xf32> to vector<8x1xf32>
    %c0_22 = arith.constant 0 : index
    %c0_23 = arith.constant 0 : index
    %c0_24 = arith.constant 0 : index
    %41 = vector.load %arg5[%c0_22, %c0_23, %c0_24] : memref<1x8x2xf32, #tpu.memory_space<vmem>>, vector<1x8x1xf32>
    %42 = vector.shape_cast %41 : vector<1x8x1xf32> to vector<8x1xf32>
    %43 = vector.shape_cast %40 : vector<8x1xf32> to vector<1x8x1xf32>
    tpu.vector_store %arg5[%c0_22, %c0_23, %c0_24], %43 {strides = array<i32>} : memref<1x8x2xf32, #tpu.memory_space<vmem>>, vector<1x8x1xf32>,
    %44 = arith.mulf %38, %32 : vector<8x288xf32>
    %cst_25 = arith.constant dense<0.000000e+00> : vector<8xf32>
    %45 = vector.multi_reduction <add>, %44, %cst_25 [1] : vector<8x288xf32> to vector<8xf32>
    %46 = vector.shape_cast %45 : vector<8xf32> to vector<8x1xf32>
    %c0_26 = arith.constant 0 : index
    %c0_27 = arith.constant 0 : index
    %c1 = arith.constant 1 : index
    %47 = vector.load %arg5[%c0_26, %c0_27, %c1] : memref<1x8x2xf32, #tpu.memory_space<vmem>>, vector<1x8x1xf32>
    %48 = vector.shape_cast %47 : vector<1x8x1xf32> to vector<8x1xf32>
    %49 = vector.shape_cast %46 : vector<8x1xf32> to vector<1x8x1xf32>
    tpu.vector_store %arg5[%c0_26, %c0_27, %c1], %49 {strides = array<i32>} : memref<1x8x2xf32, #tpu.memory_space<vmem>>, vector<1x8x1xf32>,
    return
  }
  func.func @transform_0(%arg0: i32) -> (i32, i32, i32) {
    %c0_i32 = arith.constant 0 : i32
    %c0_i32_0 = arith.constant 0 : i32
    %c0_i32_1 = arith.constant 0 : i32
    return %arg0, %c0_i32, %c0_i32_0 : i32, i32, i32
  }
  func.func @transform_1(%arg0: i32) -> (i32, i32) {
    %c0_i32 = arith.constant 0 : i32
    %c0_i32_0 = arith.constant 0 : i32
    %c0_i32_1 = arith.constant 0 : i32
    return %c0_i32, %c0_i32_0 : i32, i32
  }
  func.func @transform_2(%arg0: i32) -> (i32, i32) {
    %c0_i32 = arith.constant 0 : i32
    %c0_i32_0 = arith.constant 0 : i32
    %c0_i32_1 = arith.constant 0 : i32
    return %c0_i32, %c0_i32_0 : i32, i32
  }
  func.func @transform_3(%arg0: i32) -> (i32, i32, i32) {
    %c0_i32 = arith.constant 0 : i32
    %c0_i32_0 = arith.constant 0 : i32
    %c0_i32_1 = arith.constant 0 : i32
    return %arg0, %c0_i32, %c0_i32_0 : i32, i32, i32
  }
  func.func @transform_4(%arg0: i32) -> (i32, i32, i32) {
    %c0_i32 = arith.constant 0 : i32
    %c0_i32_0 = arith.constant 0 : i32
    %c0_i32_1 = arith.constant 0 : i32
    return %arg0, %c0_i32, %c0_i32_0 : i32, i32, i32
  }
}

module attributes {stable_mosaic.version = 11 : i64} {
  func.func @_bn_relu_kernel(%arg0: i32, %arg1: memref<1x8x16x18xf32, #tpu.memory_space<vmem>>, %arg2: memref<2x8x1x1xf32, #tpu.memory_space<vmem>>, %arg3: memref<1x8x16x16xf32, #tpu.memory_space<vmem>>) attributes {dimension_semantics = [#tpu.dimension_semantics<parallel>], iteration_bounds = array<i64: 2>, scalar_prefetch = 0 : i64, scratch_operands = 0 : i64, tpu.core_type = #tpu.core_type<tc>, window_params = [{transform_indices = @transform_0, window_bounds = array<i64: 1, 8, 16, 18>}, {pipeline_mode = #tpu.pipeline_mode<synchronous>, transform_indices = @transform_1, window_bounds = array<i64: 2, 8, 1, 1>}, {transform_indices = @transform_2, window_bounds = array<i64: 1, 8, 16, 16>}]} {
    %c0 = arith.constant 0 : index
    %c0_0 = arith.constant 0 : index
    %c0_1 = arith.constant 0 : index
    %c0_2 = arith.constant 0 : index
    %0 = vector.load %arg1[%c0, %c0_0, %c0_1, %c0_2] : memref<1x8x16x18xf32, #tpu.memory_space<vmem>>, vector<1x8x16x18xf32>
    %1 = vector.shape_cast %0 : vector<1x8x16x18xf32> to vector<8x16x18xf32>
    %2 = vector.extract_strided_slice %1 {offsets = [0, 0, 0], sizes = [8, 16, 16], strides = [1, 1, 1]} : vector<8x16x18xf32> to vector<8x16x16xf32>
    %c0_3 = arith.constant 0 : index
    %c0_4 = arith.constant 0 : index
    %c0_5 = arith.constant 0 : index
    %c0_6 = arith.constant 0 : index
    %3 = vector.load %arg2[%c0_3, %c0_4, %c0_5, %c0_6] : memref<2x8x1x1xf32, #tpu.memory_space<vmem>>, vector<1x8x1x1xf32>
    %4 = vector.shape_cast %3 : vector<1x8x1x1xf32> to vector<8x1x1xf32>
    %5 = vector.broadcast %4 : vector<8x1x1xf32> to vector<8x16x16xf32>
    %6 = arith.mulf %2, %5 : vector<8x16x16xf32>
    %c1 = arith.constant 1 : index
    %c0_7 = arith.constant 0 : index
    %c0_8 = arith.constant 0 : index
    %c0_9 = arith.constant 0 : index
    %7 = vector.load %arg2[%c1, %c0_7, %c0_8, %c0_9] : memref<2x8x1x1xf32, #tpu.memory_space<vmem>>, vector<1x8x1x1xf32>
    %8 = vector.shape_cast %7 : vector<1x8x1x1xf32> to vector<8x1x1xf32>
    %9 = vector.broadcast %8 : vector<8x1x1xf32> to vector<8x16x16xf32>
    %10 = arith.addf %6, %9 : vector<8x16x16xf32>
    %cst = arith.constant 0.000000e+00 : f32
    %11 = vector.broadcast %cst : f32 to vector<8x16x16xf32>
    %12 = arith.maximumf %10, %11 : vector<8x16x16xf32>
    %c0_10 = arith.constant 0 : index
    %c0_11 = arith.constant 0 : index
    %c0_12 = arith.constant 0 : index
    %c0_13 = arith.constant 0 : index
    %13 = vector.load %arg3[%c0_10, %c0_11, %c0_12, %c0_13] : memref<1x8x16x16xf32, #tpu.memory_space<vmem>>, vector<1x8x16x16xf32>
    %14 = vector.shape_cast %13 : vector<1x8x16x16xf32> to vector<8x16x16xf32>
    %15 = vector.shape_cast %12 : vector<8x16x16xf32> to vector<1x8x16x16xf32>
    tpu.vector_store %arg3[%c0_10, %c0_11, %c0_12, %c0_13], %15 {strides = array<i32>} : memref<1x8x16x16xf32, #tpu.memory_space<vmem>>, vector<1x8x16x16xf32>,
    return
  }
  func.func @transform_0(%arg0: i32) -> (i32, i32, i32, i32) {
    %c0_i32 = arith.constant 0 : i32
    %c0_i32_0 = arith.constant 0 : i32
    %c0_i32_1 = arith.constant 0 : i32
    %c0_i32_2 = arith.constant 0 : i32
    return %arg0, %c0_i32, %c0_i32_0, %c0_i32_1 : i32, i32, i32, i32
  }
  func.func @transform_1(%arg0: i32) -> (i32, i32, i32, i32) {
    %c0_i32 = arith.constant 0 : i32
    %c0_i32_0 = arith.constant 0 : i32
    %c0_i32_1 = arith.constant 0 : i32
    %c0_i32_2 = arith.constant 0 : i32
    %c0_i32_3 = arith.constant 0 : i32
    return %c0_i32, %c0_i32_0, %c0_i32_1, %c0_i32_2 : i32, i32, i32, i32
  }
  func.func @transform_2(%arg0: i32) -> (i32, i32, i32, i32) {
    %c0_i32 = arith.constant 0 : i32
    %c0_i32_0 = arith.constant 0 : i32
    %c0_i32_1 = arith.constant 0 : i32
    %c0_i32_2 = arith.constant 0 : i32
    return %arg0, %c0_i32, %c0_i32_0, %c0_i32_1 : i32, i32, i32, i32
  }
}

</mosaic_0001>

<bundles_post_ra>
// kernel: conv_block_pallas.3
= control target key start
LH: loop header
LB: loop body
LE: loop exit
PB: predicated region body
PF: predicated region fallthrough
CT: control target
= control target key end

     0   :  { %7 = vsyncpa [#allocation3], 0  ;;  %s841_s0 = inlined_call_operand.vmem [shape: f32[2,8,16,18], index: 0, kind: input, shape index: {}]   ;;  %s842_s1 = inlined_call_operand.vmem [shape: f32[2,8,1,1], index: 1, kind: input, shape index: {}]   ;;  %s843_s2 = inlined_call_operand.hbm [shape: f32[2,8,16,16], index: 2, kind: output, shape index: {}]  }
   0x1   :  { %9 = vsyncpa [#allocation3 + $0x1], 0  ;;  %s625_s9 = smov 0   ;;  %s627_s10 = smov 0  }
   0x2   :  { %s629_s11 = smov 0   ;;  %s631_s12 = smov 0  }
   0x3 LB: > { %s646_s13 = sadd.s32 4294967295, %s604_s12   ;;  %s460_s14 = sadd.s32 4294967294, %s604_s12   ;;  %s604_s12 = sphi %s631_s12, %s849_s12   ;;  %s600_s11 = sphi %s629_s11, %s848_s11   ;;  %s596_s10 = sphi %s627_s10, %s847_s10   ;;  %s592_s9 = sphi %s625_s9, %s846_s9  }
   0x4   : > { %s650_s15 = sadd.s32 1, %s604_s12   ;;  %s69_s16 = sadd.s32 1, %s600_s11 }
   0x5   : > { %s66_s17 = ssub.s32 %s604_s12, %s650_s15  ;;  %p79_p0 = scmp.ne.s32.totalorder %s600_s11, %s596_s10 }
   0x6   : > { %p67_p1 = scmp.eq.s32.totalorder %s66_s17, 0  ;;  %p80_p2 = scmp.eq.s32.totalorder %s646_s13, 1 }
   0x7   : > { %p85_p3 = scmp.ne.s32.totalorder %s596_s10, %s592_s9  ;;  %p86_p4 = scmp.eq.s32.totalorder %s460_s14, 1 }
   0x8   : > { %s661_s18 = scalar_select %p67_p1, %s600_s11, %s69_s16  }
   0x9   : > { %p663_p5 = por %p80_p2, %p79_p0  ;;  %p667_p6 = por %p86_p4, %p85_p3 }
   0xa   : > { %p463_p7 = scmp.ge.s32.totalorder %s604_s12, 1  ;;  %p115_p8 = scmp.lt.s32.totalorder %s604_s12, 3 }
   0xc   : > { %p116_p9 = pnand %p463_p7, %p115_p8 }
   0xd   : > { %v469_v0 = vld [vmem:[%s842_s1 + $0x2] ss:$0 sm:$0xff] (!%p116_p9)  ;;  %v467_v1 = vld [vmem:[%s842_s1] ss:$0 sm:$0xff] (!%p116_p9)  ;;  %v606_v2 = vmov (!%p116_p9), 0   ;;  %p137_p10 = scmp.lt.s32.totalorder (!%p116_p9), %s646_s13, 1 }
   0xe   : > { %119 = sbr.rel (%p116_p9) target bundleno = 191 (0xbf), region = 28  ;;  %541 = vset.pattern.permute.xlu1 (!%p116_p9), %v606_v2  ;;  %540 = vset.pattern.permute.xlu0 (!%p116_p9), %v606_v2  ;;  %v470_v3 = vld [vmem:[%s842_s1 + $0x3] ss:$0 sm:$0xff] (!%p116_p9)  ;;  %v468_v4 = vld [vmem:[%s842_s1 + $0x1] ss:$0 sm:$0xff] (!%p116_p9)  ;;  %s134_s17 = sand.u32 (!%p116_p9), 1, %s596_s10  }
   0xf   : > { %215 = vperm.xlu1 (!%p116_p9), %541, %v469_v0   ;;  %207 = vperm.xlu0 (!%p116_p9), %540, %v467_v1   ;;  %v472_v5 = vld [vmem:[%s842_s1 + $0x5] ss:$0 sm:$0xff] (!%p116_p9)  ;;  %v471_v6 = vld [vmem:[%s842_s1 + $0x4] ss:$0 sm:$0xff] (!%p116_p9)  ;;  %v474_v7 = vld [vmem:[%s842_s1 + $0x7] ss:$0 sm:$0xff] (!%p116_p9) }
  0x10   : > { %v473_v8 = vld [vmem:[%s842_s1 + $0x6] ss:$0 sm:$0xff] (!%p116_p9)  ;;  %v484_v9 = vld [vmem:[%s842_s1 + $0x9] ss:$0 sm:$0xff] (!%p116_p9)  ;;  %v483_v10 = vld [vmem:[%s842_s1 + $0x8] ss:$0 sm:$0xff] (!%p116_p9) }
  0x11   : > { %v486_v11 = vld [vmem:[%s842_s1 + $0xb] ss:$0 sm:$0xff] (!%p116_p9)  ;;  %v485_v12 = vld [vmem:[%s842_s1 + $0xa] ss:$0 sm:$0xff] (!%p116_p9)  ;;  %v488_v13 = vld [vmem:[%s842_s1 + $0xd] ss:$0 sm:$0xff] (!%p116_p9) }
  0x12   : > { %v487_v14 = vld [vmem:[%s842_s1 + $0xc] ss:$0 sm:$0xff] (!%p116_p9)  ;;  %v490_v15 = vld [vmem:[%s842_s1 + $0xf] ss:$0 sm:$0xff] (!%p116_p9)  ;;  %v489_v16 = vld [vmem:[%s842_s1 + $0xe] ss:$0 sm:$0xff] (!%p116_p9) }
  0x13   : > { %219 = vperm.xlu1 (!%p116_p9), %541, %v470_v3   ;;  %211 = vperm.xlu0 (!%p116_p9), %540, %v468_v4   ;;  %s464_s21 = sshll.u32 (!%p116_p9), %s134_s17, 7  ;;  %vm367_vm0 = vcmask (!%p116_p9), 130048   ;;  %s497_s23 = sshll.u32 (!%p116_p9), %s646_s13, 11 }
  0x14   : > { %s747_s22 = scalar_lea.vmem (!%p116_p9), [#allocation2], %s464_s21  ;;  %s786_s26 = scalar_lea.hbm (!%p116_p9), %s843_s2, %s497_s23 }
  0x15   : > { %s138_s6 = scalar_select %p137_p10, %s646_s13, 1 }
  0x16   : > { %s398_s24 = sshll.u32 %s747_s22, 4  ;;  %s800_s27 = scalar_lea.sflag [#allocation3], %s134_s17  ;;  %s788_s24 = int_to_ptr.vmem [resolvable:$true] %s398_s24 }
  0x17   : > { %227 = vperm.xlu1 %541, %v472_v5   ;;  %223 = vperm.xlu0 %540, %v471_v6   ;;  %s496_s7 = sshll.u32 %s138_s6, 7  ;;  %s542_s28 = scalar_lea.vmem %s788_s24, 2048 }
  0x18   : > { %s726_s16 = scalar_lea.vmem %s841_s0, %s496_s7  ;;  %p543_p11 = scmp.ne.s32.totalorder %s788_s24, %s542_s28 }
  0x19   : > { %v142_v23 = vld [vmem:[%s726_s16] sm:$0xff]  ;;  %v143_v24 = vld [vmem:[%s726_s16 + $0x8] sm:$0xff]  ;;  %v144_v25 = vld [vmem:[%s726_s16 + $0x10] sm:$0xff]  ;;  %s607_s29 = smov [#allocation2]  }
  0x1a   : > { %v145_v26 = vld [vmem:[%s726_s16 + $0x18] sm:$0xff]  ;;  %v146_v29 = vld [vmem:[%s726_s16 + $0x20] sm:$0xff]  ;;  %v147_v30 = vld [vmem:[%s726_s16 + $0x28] sm:$0xff]  ;;  %p544_p12 = pnand %p543_p11, %p663_p5  ;;  %s546_s30 = sshll.u32 %s607_s29, 4  ;;  %s547_s30 = int_to_ptr.vmem [resolvable:$false] %s546_s30 }
  0x1b   : > { %235 = vperm.xlu1 %541, %v474_v7   ;;  %231 = vperm.xlu0 %540, %v473_v8   ;;  %v148_v33 = vld [vmem:[%s726_s16 + $0x30] sm:$0xff]  ;;  %v149_v34 = vld [vmem:[%s726_s16 + $0x38] sm:$0xff]  ;;  %v150_v49 = vld [vmem:[%s726_s16 + $0x40] sm:$0xff]  ;;  %s548_s3 = scalar_lea.vmem %s547_s30, 4096  ;;  %p549_p0 = scmp.lt.s32.totalorder %s788_s24, %s547_s30 }
  0x1c   : > { %v152_v47 = vld [vmem:[%s726_s16 + $0x50] sm:$0xff]  ;;  %v153_v48 = vld [vmem:[%s726_s16 + $0x58] sm:$0xff]  ;;  %v151_v50 = vld [vmem:[%s726_s16 + $0x48] sm:$0xff]  ;;  %p545_p13 = pneg %p544_p12  ;;  %p550_p1 = scmp.lt.s32.totalorder %s548_s3, %s542_s28 }
  0x1d   : > { %v156_v1 = vld [vmem:[%s726_s16 + $0x70] sm:$0xff]  ;;  %v157_v2 = vld [vmem:[%s726_s16 + $0x78] sm:$0xff]  ;;  %v154_v3 = vld [vmem:[%s726_s16 + $0x60] sm:$0xff] }
  0x1e   : > { %v155_v4 = vld [vmem:[%s726_s16 + $0x68] sm:$0xff]  ;;  %p551_p2 = por %p550_p1, %p549_p0 }
  0x1f   : > { %308 = vperm.xlu1 %541, %v484_v9   ;;  %304 = vperm.xlu0 %540, %v483_v10  }
  0x20   : > { %p552_p3 = pnand %p551_p2, %p545_p13 }
  0x23   : > { %316 = vperm.xlu1 %541, %v486_v11   ;;  %312 = vperm.xlu0 %540, %v485_v12  }
  0x27   : > { %324 = vperm.xlu1 %541, %v488_v13   ;;  %320 = vperm.xlu0 %540, %v487_v14  }
  0x2b   : > { %332 = vperm.xlu1 %541, %v490_v15   ;;  %328 = vperm.xlu0 %540, %v489_v16  }
  0x8e   : > { %v216_v17 = vpop.permute.xlu1 %215  ;;  %v208_v18 = vpop.permute.xlu0 %207 }
  0x8f   : > { %v238_v31 = vmul.f32 %v208_v18, %v142_v23  ;;  %v239_v32 = vmul.f32 %v208_v18, %v143_v24  ;;  %v242_v43 = vmul.f32 %v216_v17, %v146_v29  ;;  %v243_v44 = vmul.f32 %v216_v17, %v147_v30 }
  0x92   : > { %v220_v19 = vpop.permute.xlu1 %219  ;;  %v212_v20 = vpop.permute.xlu0 %211 }
  0x93   : > { %v240_v35 = vmul.f32 %v212_v20, %v144_v25  ;;  %v241_v36 = vmul.f32 %v212_v20, %v145_v26  ;;  %v244_v45 = vmul.f32 %v220_v19, %v148_v33  ;;  %v245_v46 = vmul.f32 %v220_v19, %v149_v34 }
  0x96   : > { %v228_v21 = vpop.permute.xlu1 %227  ;;  %v224_v22 = vpop.permute.xlu0 %223 }
  0x97   : > { %v248_v61 = vmul.f32 %v228_v21, %v152_v47  ;;  %v249_v62 = vmul.f32 %v228_v21, %v153_v48  ;;  %v246_v63 = vmul.f32 %v224_v22, %v150_v49  ;;  %v247_v0 = vmul.f32 %v224_v22, %v151_v50 }
  0x9a   : > { %v732_v27 = vpop.permute.xlu1 %235  ;;  %v734_v28 = vpop.permute.xlu0 %231 }
  0x9b   : > { %v252_v15 = vmul.f32 %v732_v27, %v156_v1  ;;  %v253_v16 = vmul.f32 %v732_v27, %v157_v2  ;;  %v250_v17 = vmul.f32 %v734_v28, %v154_v3  ;;  %v251_v18 = vmul.f32 %v734_v28, %v155_v4 }
  0x9e   : > { %v309_v37 = vpop.permute.xlu1 %308  ;;  %v305_v38 = vpop.permute.xlu0 %304 }
  0x9f   : > { %v337_v39 = vadd.f32 %v309_v37, %v240_v35  ;;  %v338_v40 = vadd.f32 %v309_v37, %v241_v36  ;;  %v335_v41 = vadd.f32 %v305_v38, %v238_v31  ;;  %v336_v42 = vadd.f32 %v305_v38, %v239_v32 }
  0xa1   : > { %v353_v51 = vmax.f32 %v337_v39, 0.0  ;;  %v354_v52 = vmax.f32 %v338_v40, 0.0  ;;  %v351_v53 = vmax.f32 %v335_v41, 0.0  ;;  %v352_v54 = vmax.f32 %v336_v42, 0.0 }
  0xa2   : > { %v317_v55 = vpop.permute.xlu1 %316  ;;  %v313_v56 = vpop.permute.xlu0 %312 }
  0xa3   : > { %370 = vst.msk [vmem:[%s747_s22 + $0x10] sm:$0xff] %vm367_vm0, %v353_v51  ;;  %371 = vst.msk [vmem:[%s747_s22 + $0x18] sm:$0xff] %vm367_vm0, %v354_v52  ;;  %v341_v57 = vadd.f32 %v317_v55, %v244_v45  ;;  %v342_v58 = vadd.f32 %v317_v55, %v245_v46  ;;  %v339_v59 = vadd.f32 %v313_v56, %v242_v43 }
  0xa4   : > { %368 = vst.msk [vmem:[%s747_s22] sm:$0xff] %vm367_vm0, %v351_v53  ;;  %369 = vst.msk [vmem:[%s747_s22 + $0x8] sm:$0xff] %vm367_vm0, %v352_v54  ;;  %v340_v60 = vadd.f32 %v313_v56, %v243_v44 }
  0xa5   : > { %v357_v5 = vmax.f32 %v341_v57, 0.0  ;;  %v358_v6 = vmax.f32 %v342_v58, 0.0  ;;  %v355_v7 = vmax.f32 %v339_v59, 0.0 }
  0xa6   : > { %v356_v8 = vmax.f32 %v340_v60, 0.0  ;;  %v325_v9 = vpop.permute.xlu1 %324  ;;  %v321_v10 = vpop.permute.xlu0 %320 }
  0xa7   : > { %374 = vst.msk [vmem:[%s747_s22 + $0x30] sm:$0xff] %vm367_vm0, %v357_v5  ;;  %375 = vst.msk [vmem:[%s747_s22 + $0x38] sm:$0xff] %vm367_vm0, %v358_v6  ;;  %v345_v11 = vadd.f32 %v325_v9, %v248_v61  ;;  %v346_v12 = vadd.f32 %v325_v9, %v249_v62  ;;  %v343_v13 = vadd.f32 %v321_v10, %v246_v63 }
  0xa8   : > { %372 = vst.msk [vmem:[%s747_s22 + $0x20] sm:$0xff] %vm367_vm0, %v355_v7  ;;  %373 = vst.msk [vmem:[%s747_s22 + $0x28] sm:$0xff] %vm367_vm0, %v356_v8  ;;  %v344_v14 = vadd.f32 %v321_v10, %v247_v0 }
  0xa9   : > { %v361_v19 = vmax.f32 %v345_v11, 0.0  ;;  %v362_v20 = vmax.f32 %v346_v12, 0.0  ;;  %v359_v21 = vmax.f32 %v343_v13, 0.0 }
  0xaa   : > { %v360_v22 = vmax.f32 %v344_v14, 0.0  ;;  %v333_v23 = vpop.permute.xlu1 %332  ;;  %v329_v24 = vpop.permute.xlu0 %328 }
  0xab   : > { %378 = vst.msk [vmem:[%s747_s22 + $0x50] sm:$0xff] %vm367_vm0, %v361_v19  ;;  %379 = vst.msk [vmem:[%s747_s22 + $0x58] sm:$0xff] %vm367_vm0, %v362_v20  ;;  %v349_v25 = vadd.f32 %v333_v23, %v252_v15  ;;  %v350_v26 = vadd.f32 %v333_v23, %v253_v16  ;;  %v347_v27 = vadd.f32 %v329_v24, %v250_v17 }
  0xac   : > { %376 = vst.msk [vmem:[%s747_s22 + $0x40] sm:$0xff] %vm367_vm0, %v359_v21  ;;  %377 = vst.msk [vmem:[%s747_s22 + $0x48] sm:$0xff] %vm367_vm0, %v360_v22  ;;  %v348_v28 = vadd.f32 %v329_v24, %v251_v18 }
  0xad   : > { %v365_v29 = vmax.f32 %v349_v25, 0.0  ;;  %v366_v30 = vmax.f32 %v350_v26, 0.0  ;;  %v363_v31 = vmax.f32 %v347_v27, 0.0 }
  0xae   : > { %v364_v32 = vmax.f32 %v348_v28, 0.0 }
  0xaf   : > { %382 = vst.msk [vmem:[%s747_s22 + $0x70] sm:$0xff] %vm367_vm0, %v365_v29  ;;  %383 = vst.msk [vmem:[%s747_s22 + $0x78] sm:$0xff] %vm367_vm0, %v366_v30 }
  0xb0   : > { %380 = vst.msk [vmem:[%s747_s22 + $0x60] sm:$0xff] %vm367_vm0, %v363_v31  ;;  %381 = vst.msk [vmem:[%s747_s22 + $0x68] sm:$0xff] %vm367_vm0, %v364_v32 }
  0xb1   : > { %555 = shalt.err (!%p552_p3)
}
  0xb2   : > { %s556_s4 = scalar_lea.hbm %s786_s26, 2048  ;;  %s560_s7 = scalar_lea.hbm %s843_s2, 4096 }
  0xb3   : > { %p557_p4 = scmp.ne.s32.totalorder %s786_s26, %s556_s4  ;;  %p561_p9 = scmp.lt.u32.totalorder %s786_s26, %s843_s2 }
  0xb4   : > { %p562_p10 = scmp.lt.u32.totalorder %s560_s7, %s556_s4  ;;  %p564_p12 = scmp.lt.u32.totalorder %s556_s4, %s786_s26 }
  0xb5   : > { %p558_p7 = pnand %p557_p4, %p663_p5 }
  0xb6   : > { %p563_p11 = por %p562_p10, %p561_p9 }
  0xb7   : > { %p559_p8 = pneg %p558_p7 }
  0xb8   : > { %p565_p13 = por %p564_p12, %p563_p11 }
  0xba   : > { %p566_p0 = pnand %p565_p13, %p559_p8 }
  0xbc   : > { %569 = shalt.err (!%p566_p0)
}
  0xbd   : > { %s608_s16 = smov 128   ;;  %s609_s17 = smov 8  }
  0xbe   : > { %498 = dma.vmem_to_hbm [thread:$0]  (%p663_p5), %s788_s24, 2048, %s786_s26, %s800_s27, %s608_s16, %s608_s16, %s609_s17  }
  0xbf PF: > { %p504_p1 = scmp.ge.s32.totalorder %s604_s12, 2  ;;  %s413_s21 = sand.u32 1, %s592_s9  }
  0xc0   : > { %s414_s22 = scalar_lea.sflag [#allocation3], %s413_s21 }
  0xc1   : > { %p501_p2 = pnand %p504_p1, %p667_p6 }
  0xc3   : > { %587 = dma.done.wait (!%p501_p2), %s414_s22, 2048  }
  0xc4   : > { %589 = vsyncadd (!%p501_p2), %s414_s22, 4294965248  ;;  %p12_p3 = scmp.ge.s32.totalorder %s650_s15, 4   ;;  %s846_s9 = smov %s596_s10 }
  0xc5   : > { %s847_s10 = smov %s600_s11  ;;  %s848_s11 = smov %s661_s18 }
  0xc6   : > { %s849_s12 = smov %s650_s15  ;;  %14 = sbr.rel (!%p12_p3) target bundleno = 3 (0x3), region = 64 }
  0xcd   :  { %419 = vsyncpa [#allocation3], 1 }
  0xce   :  { %421 = vsyncpa [#allocation3 + $0x1], 1 }

// kernel: conv_block_pallas.2
= control target key start
LH: loop header
LB: loop body
LE: loop exit
PB: predicated region body
PF: predicated region fallthrough
CT: control target
= control target key end

     0   :  { %s742_s15 = smov 0   ;;  %s825_s0 = inlined_call_operand.vmem [shape: bf16[2,4,384], index: 0, kind: input, shape index: {}]   ;;  %s826_s1 = inlined_call_operand.vmem [shape: bf16[8,36], index: 1, kind: input, shape index: {}]   ;;  %s827_s2 = inlined_call_operand.vmem [shape: f32[1,288], index: 2, kind: input, shape index: {}]   ;;  %s828_s3 = inlined_call_operand.vmem [shape: f32[2,8,288], index: 3, kind: output, shape index: {0}]   ;;  %s829_s4 = inlined_call_operand.vmem [shape: f32[2,8,2], index: 4, kind: output, shape index: {1}]  }
   0x1 LB: > { %s610_s16 = sadd.s32 4294967295, %s704_s15   ;;  %p614_p0 = scmp.ge.s32.totalorder %s704_s15, 1  ;;  %s704_s15 = sphi %s742_s15, %s15_s15  }
   0x2   : > { %p165_p1 = scmp.lt.s32.totalorder %s704_s15, 3 }
   0x4   : > { %p166_p2 = pnand %p614_p0, %p165_p1 }
   0x5   : > { %p195_p3 = scmp.lt.s32.totalorder (!%p166_p2), %s610_s16, 1  ;;  %vm218_vm0 = vcmask (!%p166_p2), 257024   ;;  %s706_s21 = smov (!%p166_p2), 127   ;;  %v709_v5 = vmov (!%p166_p2), 0.0   ;;  %v715_v7 = vmov (!%p166_p2), 0   ;;  %vm716_vm1 = vmmov (!%p166_p2), 0  }
   0x6   : > { %169 = sbr.rel (%p166_p2) target bundleno = 548 (0x224), region = 32  ;;  %s707_s22 = smov (!%p166_p2), 110   ;;  %627 = vmatprep.subr.bf16.mxu1 (!%p166_p2), %v709_v5  ;;  %434 = vmatprep.mubr.bf16.mxu0 (!%p166_p2), %v715_v7  ;;  %v226_v8 = vlaneseq (!%p166_p2)  ;;  %vm243_vm3 = vcmask (!%p166_p2), 261124   ;;  %vm392_vm11 = vcmask (!%p166_p2), 1041408   ;;  %vm388_vm12 = vcmask (!%p166_p2), 293888  }
   0x7   : > { %s708_s23 = smov (!%p166_p2), 126   ;;  %s710_s24 = smov (!%p166_p2), 91   ;;  %633 = vmatprep.mubr.msk.bf16.mxu1 (!%p166_p2), %vm716_vm1, %v709_v5  ;;  %vm485_vm13 = vcmask (!%p166_p2), 261120   ;;  %vm512_vm14 = vcmask (!%p166_p2), 7168   ;;  %vm522_vm15 = vcmask (!%p166_p2), 15368  }
   0x8   : > { %s711_s25 = smov (!%p166_p2), 108   ;;  %s712_s26 = smov (!%p166_p2), 92   ;;  %v760_v10 = vand.u32 (!%p166_p2), 127, %v226_v8 }
   0x9   : > { %s713_s27 = smov (!%p166_p2), 109   ;;  %s714_s28 = smov (!%p166_p2), 90  }
   0xa   : > { %vm228_vm2 = vcmp.lt.s32.totalorder (!%p166_p2), %v760_v10, 127  ;;  %vm264_vm4 = vcmp.lt.s32.totalorder (!%p166_p2), %v760_v10, 110  ;;  %vm251_vm5 = vcmp.lt.s32.totalorder (!%p166_p2), %v760_v10, 126  ;;  %vm334_vm6 = vcmp.lt.s32.totalorder (!%p166_p2), %v760_v10, 91 }
   0xb   : > { %vm299_vm7 = vcmp.lt.s32.totalorder (!%p166_p2), %v760_v10, 108  ;;  %vm321_vm8 = vcmp.lt.s32.totalorder (!%p166_p2), %v760_v10, 92  ;;  %vm286_vm9 = vcmp.lt.s32.totalorder (!%p166_p2), %v760_v10, 109  ;;  %vm356_vm10 = vcmp.lt.s32.totalorder (!%p166_p2), %v760_v10, 90 }
   0xd   : > { %s831_s16 = smov (!%p195_p3, %s610_s16), 1 }
   0xe   : > { %s637_s17 = smul.u32 6, %s831_s16  ;;  %s617_s11 = sshll.u32 %s831_s16, 3 }
   0xf   : > { %s638_s5 = smul.u32 24, %s831_s16  ;;  %s208_s14 = scalar_lea.vmem %s829_s4, %s617_s11 }
  0x10   : > { %s199_s20 = scalar_lea.vmem %s825_s0, %s637_s17 }
  0x11   : > { %v210_v0 = vld [vmem:[%s199_s20] sm:$0x3f]  ;;  %s204_s10 = scalar_lea.vmem %s828_s3, %s638_s5 }
  0x12   : > { %v211_v1 = vunpack.c.l.bf16 %v210_v0  ;;  %v212_v2 = vunpack.c.h.bf16 %v210_v0 }
  0x14   : > { %220 = vrot.lane.b32.xlu1 %v211_v1, %s706_s21  ;;  %216 = vst [vmem:[#allocation2] sm:$0xf] %v211_v1  ;;  %v214_v3 = vcombine.high %v211_v1, %v211_v1  ;;  %219 = vst.msk [vmem:[#allocation2 + $0x10] sm:$0xf] %vm218_vm0, %v212_v2 }
  0x16   : > { %v658_v4 = vpack.i.bf16 %v212_v2, %v214_v3  ;;  %217 = vst [vmem:[#allocation2 + $0x8] sm:$0xf] %v214_v3  ;;  %v693_v6 = vpack.i.bf16 %v214_v3, %v211_v1 }
  0x18   : > { %258 = vrot.lane.b32.xlu1 %v211_v1, %s707_s22  ;;  %659 = vrot.lane.b32.xlu0 %v658_v4, %s706_s21 }
  0x1c   : > { %245 = vrot.lane.b32.xlu1 %v211_v1, %s708_s23  ;;  %664 = vrot.lane.b32.xlu0 %v658_v4, %s707_s22 }
  0x20   : > { %679 = vrot.lane.b32.xlu1 %v658_v4, %s710_s24  ;;  %669 = vrot.lane.b32.xlu0 %v658_v4, %s708_s23 }
  0x24   : > { %328 = vrot.lane.b32.xlu1 %v211_v1, %s710_s24  ;;  %674 = vrot.lane.b32.xlu0 %v658_v4, %s711_s25 }
  0x28   : > { %689 = vrot.lane.b32.xlu1 %v658_v4, %s712_s26  ;;  %293 = vrot.lane.b32.xlu0 %v211_v1, %s711_s25 }
  0x2c   : > { %315 = vrot.lane.b32.xlu1 %v211_v1, %s712_s26  ;;  %684 = vrot.lane.b32.xlu0 %v658_v4, %s713_s27 }
  0x30   : > { %280 = vrot.lane.b32.xlu0 %v211_v1, %s713_s27  ;;  %354 = vrot.lane.b32.xlu1 %v212_v2, %s714_s28 }
  0x34   : > { %694 = vrot.lane.b32.xlu0 %v693_v6, %s714_s28 }
  0x86   : > { %v221_v9 = vpop.permute.xlu1 %220 }
  0x8a   : > { %v259_v11 = vpop.permute.xlu1 %258  ;;  %v660_v12 = vpop.permute.xlu0 %659 }
  0x8b   : > { %v662_v13 = vunpack.i.h.bf16 %v660_v12  ;;  %v661_v14 = vunpack.i.l.bf16 %v660_v12 }
  0x8d   : > { %v231_v15 = vsel %vm228_vm2, %v662_v13, %v221_v9  ;;  %v229_v16 = vsel %vm228_vm2, %v661_v14, %v662_v13  ;;  %v230_v17 = vsel %vm228_vm2, %v221_v9, %v661_v14 }
  0x8e   : > { %v237_v18 = vrot.slane %v231_v15, 4  ;;  %v235_v19 = vrot.slane %v230_v17, 4  ;;  %v236_v20 = vrot.slane %v229_v16, 4  ;;  %v246_v21 = vpop.permute.xlu1 %245  ;;  %v665_v22 = vpop.permute.xlu0 %664 }
  0x8f   : > { %v667_v23 = vunpack.i.h.bf16 %v665_v22  ;;  %v666_v24 = vunpack.i.l.bf16 %v665_v22 }
  0x90   : > { %241 = vst [vmem:[#allocation2] sm:$0xf0] %v235_v19  ;;  %242 = vst [vmem:[#allocation2 + $0x8] sm:$0xf0] %v236_v20 }
  0x91   : > { %244 = vst.msk [vmem:[#allocation2 + $0x10] sm:$0xf0] %vm243_vm3, %v237_v18  ;;  %v267_v25 = vsel %vm264_vm4, %v667_v23, %v259_v11  ;;  %v265_v26 = vsel %vm264_vm4, %v666_v24, %v667_v23  ;;  %v266_v27 = vsel %vm264_vm4, %v259_v11, %v666_v24 }
  0x92   : > { %v273_v28 = vrot.slane %v267_v25, 4  ;;  %v271_v29 = vrot.slane %v266_v27, 4  ;;  %v272_v30 = vrot.slane %v265_v26, 4  ;;  %v680_v31 = vpop.permute.xlu1 %679  ;;  %v670_v32 = vpop.permute.xlu0 %669 }
  0x93   : > { %v682_v33 = vunpack.i.h.bf16 %v680_v31  ;;  %v681_v34 = vunpack.i.l.bf16 %v680_v31  ;;  %v672_v35 = vunpack.i.h.bf16 %v670_v32  ;;  %v671_v36 = vunpack.i.l.bf16 %v670_v32 }
  0x94   : > { %277 = vst [vmem:[#allocation2 + $0x18] sm:$0xf0] %v271_v29  ;;  %278 = vst [vmem:[#allocation2 + $0x20] sm:$0xf0] %v272_v30 }
  0x95   : > { %279 = vst.msk [vmem:[#allocation2 + $0x28] sm:$0xf0] %vm243_vm3, %v273_v28  ;;  %v254_v37 = vsel %vm251_vm5, %v672_v35, %v246_v21  ;;  %v252_v38 = vsel %vm251_vm5, %v671_v36, %v672_v35  ;;  %v253_v39 = vsel %vm251_vm5, %v246_v21, %v671_v36  ;;  %v335_v40 = vsel %vm334_vm6, %v681_v34, %v682_v33 }
  0x96   : > { %257 = vst.msk [vmem:[#allocation2 + $0x28] sm:$0xf] %vm218_vm0, %v254_v37  ;;  %255 = vst [vmem:[#allocation2 + $0x18] sm:$0xf] %v253_v39  ;;  %v329_v41 = vpop.permute.xlu1 %328  ;;  %v342_v42 = vrot.slane %v335_v40, 4  ;;  %v675_v43 = vpop.permute.xlu0 %674 }
  0x97   : > { %256 = vst [vmem:[#allocation2 + $0x20] sm:$0xf] %v252_v38  ;;  %v336_v44 = vsel %vm334_vm6, %v329_v41, %v681_v34  ;;  %v337_v45 = vsel %vm334_vm6, %v682_v33, %v329_v41  ;;  %v677_v46 = vunpack.i.h.bf16 %v675_v43  ;;  %v676_v47 = vunpack.i.l.bf16 %v675_v43  ;;  %v364_v60 = vld [vmem:[#allocation2 + $0x8] sm:$0xff]  ;;  %v363_v62 = vld [vmem:[#allocation2] sm:$0xff] }
  0x98   : > { %v341_v48 = vrot.slane %v336_v44, 4  ;;  %v343_v49 = vrot.slane %v337_v45, 4  ;;  %348 = vst [vmem:[#allocation2 + $0x50] sm:$0xf0] %v342_v42  ;;  %v365_v61 = vld [vmem:[#allocation2 + $0x10] sm:$0xff] }
  0x99   : > { %v300_v50 = vsel %vm299_vm7, %v676_v47, %v677_v46  ;;  %v387_v42 = vld [vmem:[%s826_s1] sm:$0xf] }
  0x9a   : > { %347 = vst [vmem:[#allocation2 + $0x48] sm:$0xf0] %v341_v48  ;;  %349 = vst.msk [vmem:[#allocation2 + $0x58] sm:$0xf0] %vm243_vm3, %v343_v49  ;;  %v690_v51 = vpop.permute.xlu1 %689  ;;  %v294_v52 = vpop.permute.xlu0 %293  ;;  %v307_v53 = vrot.slane %v300_v50, 4 }
  0x9b   : > { %v692_v54 = vunpack.i.h.bf16 %v690_v51  ;;  %v691_v55 = vunpack.i.l.bf16 %v690_v51  ;;  %v301_v56 = vsel %vm299_vm7, %v294_v52, %v676_v47  ;;  %v302_v57 = vsel %vm299_vm7, %v677_v46, %v294_v52  ;;  %v487_v45 = vld [vmem:[%s827_s2] sm:$0x7] }
  0x9c   : > { %v306_v58 = vrot.slane %v301_v56, 4  ;;  %v308_v59 = vrot.slane %v302_v57, 4  ;;  %313 = vst [vmem:[#allocation2 + $0x38] sm:$0xf0] %v307_v53 }
  0x9d   : > { %v322_v63 = vsel %vm321_vm8, %v691_v55, %v692_v54  ;;  %v368_v1 = vld [vmem:[#allocation2 + $0x28] sm:$0xff]  ;;  %v366_v2 = vld [vmem:[#allocation2 + $0x18] sm:$0xff] }
  0x9e   : > { %v367_v0 = vld [vmem:[#allocation2 + $0x20] sm:$0xff]  ;;  %312 = vst [vmem:[#allocation2 + $0x30] sm:$0xf0] %v306_v58  ;;  %314 = vst.msk [vmem:[#allocation2 + $0x40] sm:$0xf0] %vm243_vm3, %v308_v59  ;;  %v316_v3 = vpop.permute.xlu1 %315  ;;  %v685_v4 = vpop.permute.xlu0 %684  ;;  %v380_v7 = vpack.c.bf16 %v368_v1, %v365_v61  ;;  %v378_v9 = vpack.c.bf16 %v366_v2, %v363_v62 }
  0x9f   : > { %326 = vst [vmem:[#allocation2 + $0x50] sm:$0xf] %v322_v63  ;;  %v379_v6 = vpack.c.bf16 %v367_v0, %v364_v60  ;;  %v323_v11 = vsel %vm321_vm8, %v316_v3, %v691_v55  ;;  %v324_v12 = vsel %vm321_vm8, %v692_v54, %v316_v3  ;;  %v687_v13 = vunpack.i.h.bf16 %v685_v4 }
  0xa0   : > { %v686_v14 = vunpack.i.l.bf16 %v685_v4  ;;  %325 = vst [vmem:[#allocation2 + $0x48] sm:$0xf] %v323_v11  ;;  %327 = vst.msk [vmem:[#allocation2 + $0x58] sm:$0xf] %vm218_vm0, %v324_v12  ;;  %628 = vmatpush3.bf16.msra.mxu1 %v380_v7 }
  0xa1   : > { %402 = vmatprep.subr.bf16.mxu0 %v379_v6  ;;  %629 = vmatprep.subr.bf16.mxu1 %v709_v5 }
  0xa2   : > { %403 = vmatpush1.bf16.msra.mxu0 %v378_v9  ;;  %v287_v15 = vsel %vm286_vm9, %v686_v14, %v687_v13  ;;  %v281_v16 = vpop.permute.xlu0 %280  ;;  %v355_v20 = vpop.permute.xlu1 %354 }
  0xa3   : > { %291 = vst [vmem:[#allocation2 + $0x38] sm:$0xf] %v287_v15  ;;  %v288_v17 = vsel %vm286_vm9, %v281_v16, %v686_v14  ;;  %v289_v18 = vsel %vm286_vm9, %v687_v13, %v281_v16 }
  0xa4   : > { %290 = vst [vmem:[#allocation2 + $0x30] sm:$0xf] %v288_v17  ;;  %292 = vst.msk [vmem:[#allocation2 + $0x40] sm:$0xf] %vm218_vm0, %v289_v18 }
  0xa6   : > { %v695_v19 = vpop.permute.xlu0 %694  ;;  %v373_v27 = vld [vmem:[#allocation2 + $0x50] sm:$0xff] }
  0xa7   : > { %v697_v21 = vunpack.i.h.bf16 %v695_v19  ;;  %v696_v22 = vunpack.i.l.bf16 %v695_v19  ;;  %v372_v29 = vld [vmem:[#allocation2 + $0x48] sm:$0xff]  ;;  %v374_v32 = vld [vmem:[#allocation2 + $0x58] sm:$0xff] }
  0xa9   : > { %v357_v23 = vsel %vm356_vm10, %v697_v21, %v355_v20  ;;  %v358_v24 = vsel %vm356_vm10, %v696_v22, %v697_v21  ;;  %v359_v25 = vsel %vm356_vm10, %v355_v20, %v696_v22 }
  0xaa   : > { %v370_v26 = vld [vmem:[#allocation2 + $0x38] sm:$0xff]  ;;  %360 = vst [vmem:[#allocation2 + $0x60] sm:$0xf] %v358_v24  ;;  %361 = vst [vmem:[#allocation2 + $0x68] sm:$0xf] %v357_v23 }
  0xab   : > { %362 = vst.msk [vmem:[#allocation2 + $0x70] sm:$0xf] %vm218_vm0, %v359_v25  ;;  %v382_v28 = vpack.c.bf16 %v373_v27, %v370_v26  ;;  %v369_v30 = vld [vmem:[#allocation2 + $0x30] sm:$0xff]  ;;  %v371_v31 = vld [vmem:[#allocation2 + $0x40] sm:$0xff] }
  0xac   : > { %v381_v33 = vpack.c.bf16 %v372_v29, %v369_v30  ;;  %v383_v10 = vpack.c.bf16 %v374_v32, %v371_v31 }
  0xad   : > { %404 = vmatprep.subr.bf16.mxu0 %v382_v28 }
  0xae   : > { %405 = vmatpush1.bf16.msra.mxu0 %v381_v33  ;;  %630 = vmatpush3.bf16.msra.mxu1 %v383_v10 }
  0xaf   : > { %631 = vmatprep.subr.bf16.mxu1 %v709_v5  ;;  %v490_v5 = vshrl.u32 %v226_v8, 7 }
  0xb1   : > { %v376_v34 = vld [vmem:[#allocation2 + $0x68] sm:$0xf]  ;;  %v375_v35 = vld [vmem:[#allocation2 + $0x60] sm:$0xf]  ;;  %v491_v43 = vsub.s32 0, %v490_v5  ;;  %v499_v44 = vsub.s32 2, %v490_v5 }
  0xb2   : > { %v377_v36 = vld [vmem:[#allocation2 + $0x70] sm:$0xf]  ;;  %v385_v37 = vpack.c.bf16 %v376_v34, %v376_v34  ;;  %v384_v38 = vpack.c.bf16 %v375_v35, %v375_v35  ;;  %v495_v46 = vsub.s32 1, %v490_v5 }
  0xb3   : > { %v386_v39 = vpack.c.bf16 %v377_v36, %v377_v36  ;;  %v492_v47 = vrot.slane %v487_v45, %v491_v43  ;;  %v500_v48 = vrot.slane %v487_v45, %v499_v44 }
  0xb4   : > { %618 = vmatprep.subr.msk.bf16.mxu0 %vm392_vm11, %v385_v37  ;;  %v394_v40 = vsel %vm392_vm11, %v384_v38, 0  ;;  %v496_v49 = vrot.slane %v487_v45, %v495_v46 }
  0xb5   : > { %v400_v41 = vsel %vm392_vm11, %v386_v39, 0  ;;  %407 = vmatpush1.bf16.msra.mxu0 %v394_v40 }
  0xb6   : > { %632 = vmatpush3.bf16.msra.mxu1 %v400_v41 }
  0xb8   : > { %619 = vmatmul.mubr.msk.bf16.vlgmr.msra.gmra.mrb[0].mxu0 %vm388_vm12, %v387_v42 }
  0xb9   : > { %634 = vmatmul.mubr.msk.bf16.vlgmr.msra.gmra.mrb[0].mxu1 %vm388_vm12, %v387_v42 }
 0x18b   : > { %v436_v50 = vpop.f32.mrb[0].mxu0 }
 0x18c   : > { %v477_v51 = vpop.f32.mrb[0].mxu1  ;;  %483 = vst [vmem:[%s204_s10] sm:$0xff] %v436_v50  ;;  %v504_v8 = vmul.f32 %v492_v47, %v436_v50  ;;  %v438_v53 = vpop.f32.mrb[1].mxu0 }
 0x18d   : > { %486 = vst.msk [vmem:[%s204_s10 + $0x10] sm:$0xff] %vm485_vm13, %v477_v51  ;;  %v506_v52 = vmul.f32 %v500_v48, %v477_v51  ;;  %v635_v54 = vpop.f32.mrb[1].mxu1  ;;  %484 = vst [vmem:[%s204_s10 + $0x8] sm:$0xff] %v438_v53  ;;  %v505_v55 = vmul.f32 %v496_v49, %v438_v53  ;;  %v440_v56 = vpop.f32.mrb[2].mxu0 }
 0x18e   : > { %v480_v57 = vpop.f32.mrb[2].mxu1  ;;  %v514_v58 = vmul.f32 %v504_v8, %v436_v50  ;;  %v441_v60 = vpop.f32.mrb[3].mxu0 }
 0x18f   : > { %v516_v59 = vmul.f32 %v506_v52, %v477_v51  ;;  %v636_v61 = vpop.f32.mrb[3].mxu1  ;;  %v508_v62 = vsel %vm485_vm13, %v506_v52, 0.0  ;;  %v515_v63 = vmul.f32 %v505_v55, %v438_v53  ;;  %v507_v0 = vadd.f32 %v505_v55, %v504_v8 }
 0x191   : > { %v509_v1 = vadd.f32 %v508_v62, %v507_v0  ;;  %v517_v2 = vadd.f32 %v515_v63, %v514_v58  ;;  %v518_v3 = vsel %vm485_vm13, %v516_v59, 0.0 }
 0x193   : > { %510 = vadd.xlane.f32.xlu0 %v509_v1  ;;  %v519_v4 = vadd.f32 %v518_v3, %v517_v2 }
 0x195   : > { %520 = vadd.xlane.f32.xlu1 %v519_v4 }
 0x220   : > { %v511_v6 = vpop.xlane.xlu0 %510 }
 0x221   : > { %513 = vst.msk [vmem:[%s208_s14] sm:$0xff] %vm512_vm14, %v511_v6 }
 0x222   : > { %v521_v7 = vpop.xlane.xlu1 %520 }
 0x223   : > { %523 = vst.msk [vmem:[%s208_s14] sm:$0xff] %vm522_vm15, %v521_v7 }
 0x224 PF: > { %s15_s15 = sadd.s32 1, %s704_s15  }
 0x225   : > { %p12_p4 = scmp.ge.s32.totalorder %s15_s15, 4  }
 0x227   :  { %14 = sbr.rel (!%p12_p4) target bundleno = 1 (0x1), region = 74 }

</bundles_post_ra>
